<compile_context>
chip_gen: v5e
topology: v5e:2x2
jax: 0.10.0
libtpu: 0.0.40
codegen_flags: <defaults>
</compile_context>

<pallas_src>
import functools

import jax
import jax.numpy as jnp
from jax import lax
from jax.experimental import pallas as pl
from jax.experimental.pallas import tpu as pltpu

EPS = 1e-5  # torch BatchNorm2d default eps


# --------------------------------------------------------------------------
# Fully fused UpSample kernel (single pallas_call, everything in VMEM)
# --------------------------------------------------------------------------
def _fused_upsample_kernel(
    x1_ref,      # (R, Wh*Cin)         bf16  decoder features, one super-row per row
    x2_ref,      # (R, 2*Wup*Cskip)    bf16  cropped skip, lanes = [even row | odd row]
    wu0_ref,     # (Wh*Cin, P1)        bf16  convT folded into conv1, tap super-row s
    wu1_ref,     # (Wh*Cin, P1)        bf16  convT folded into conv1, tap super-row s+1
    ws0_ref,     # (2*Wup*Cskip, P1)   bf16  conv1 skip-channel matrix, tap s
    ws1_ref,     # (2*Wup*Cskip, P1)   bf16  conv1 skip-channel matrix, tap s+1
    bn1_ref,     # (3, P1)             f32   rows: fused conv1 bias, bn1 gamma, bn1 beta
    wc0_ref,     # (P1, P2)            bf16  conv2 matrix, tap s
    wc1_ref,     # (P1, P2)            bf16  conv2 matrix, tap s+1
    bn2_ref,     # (3, P2)             f32   rows: conv2 bias, bn2 gamma, bn2 beta
    sel1_ref,    # (P1, Cout)          f32   lane -> channel reduction matrix
    sel1t_ref,   # (Cout, P1)          f32   channel -> lane broadcast matrix
    sel2_ref,    # (P2, Cout)          f32
    sel2t_ref,   # (Cout, P2)          f32
    o_ref,       # (R, P2)             f32   P1 = 2*Wo1*Cout, P2 = 2*Wo2*Cout
    *, hh, count1, count2,
):
  f32 = jnp.float32
  rows = x1_ref.shape[0]
  # Per-image super-row index; hoisted once (used by both BN masks).
  srow = lax.broadcasted_iota(jnp.int32, (rows, 1), 0) % hh

  def shift_up(y):
    # result[s] = y[s+1]; the wrapped-in last row is zeroed (it only feeds rows that the
    # BN mask / output slice discard).
    # TODO(synk): switch to pltpu.roll (XLU, copy-free) once its row direction is pinned
    # by a unit test; this is a single 1-super-row shift per conv on a small slab.
    return jnp.concatenate([y[1:, :], jnp.zeros((1, y.shape[1]), y.dtype)], axis=0)

  def bn_relu(acc, valid_rows, count, bn_ref, sel_ref, selt_ref):
    # torch BatchNorm2d training-mode batch stats (biased variance) over the *valid*
    # output positions, fused into ONE masked pass (sum + sum-of-squares).
    acc = acc + bn_ref[0:1, :]                           # conv bias
    mask = (srow < valid_rows).astype(f32)
    am = acc * mask
    sums = jnp.sum(am, axis=0, keepdims=True)            # (1, P)
    sumsq = jnp.sum(am * acc, axis=0, keepdims=True)     # (1, P)   (mask^2 == mask)
    inv_n = 1.0 / count
    mean_c = jnp.dot(sums, sel_ref[...], preferred_element_type=f32) * inv_n   # (1, Cout)
    ex2_c = jnp.dot(sumsq, sel_ref[...], preferred_element_type=f32) * inv_n
    inv_c = lax.rsqrt(ex2_c - mean_c * mean_c + EPS)      # biased var, like torch train()
    mean_r = jnp.dot(mean_c, selt_ref[...], preferred_element_type=f32)        # (1, P)
    scale_r = jnp.dot(inv_c, selt_ref[...], preferred_element_type=f32) * bn_ref[1:2, :]
    return jnp.maximum((acc - mean_r) * scale_r + bn_ref[2:3, :], 0.0)

  # ---- ConvTranspose2d + crop_and_concat + Conv2d #1: four matmuls + one row shift ----
  x1 = x1_ref[...]
  x2 = x2_ref[...]
  t0 = (jnp.dot(x1, wu0_ref[...], preferred_element_type=f32) +
        jnp.dot(x2, ws0_ref[...], preferred_element_type=f32))
  t1 = (jnp.dot(x1, wu1_ref[...], preferred_element_type=f32) +
        jnp.dot(x2, ws1_ref[...], preferred_element_type=f32))
  acc1 = t0 + shift_up(t1)
  act1 = bn_relu(acc1, hh - 1, count1, bn1_ref, sel1_ref, sel1t_ref)

  # ---- Conv2d #2 + BN + ReLU ----
  a1b = act1.astype(jnp.bfloat16)
  acc2 = (jnp.dot(a1b, wc0_ref[...], preferred_element_type=f32) +
          shift_up(jnp.dot(a1b, wc1_ref[...], preferred_element_type=f32)))
  o_ref[...] = bn_relu(acc2, hh - 2, count2, bn2_ref, sel2_ref, sel2t_ref)


# --------------------------------------------------------------------------
# Weight packing into the parity-in-lanes matrices consumed by the kernel (tiny, one-off)
# --------------------------------------------------------------------------
def _pack_upsample(params, hh, wh, cskip):
  wt, bt = params["convt_w"], params["convt_b"]       # (Cin, Cout, 2, 2), (Cout,)
  w1p, b1 = params["conv1_w"], params["conv1_b"]      # (Cout, Cin, 3, 3), (Cout,)
  g1, be1 = params["bn1_g"], params["bn1_b"]
  w2p, b2 = params["conv2_w"], params["conv2_b"]      # (Cout, Cout, 3, 3), (Cout,)
  g2, be2 = params["bn2_g"], params["bn2_b"]

  cin, cout = wt.shape[0], wt.shape[1]
  wup = 2 * wh
  wo1, wo2 = wup - 2, wup - 4
  f32, bf16 = jnp.float32, jnp.bfloat16

  # ConvT row matrices, one per output-row parity kh:
  #   A_kh[(x*Cin+ci), ((2x+kw)*Cout+co)] = wt[ci, co, kh, kw]
  a_par = []
  for kh in range(2):
    a = jnp.zeros((wh * cin, wup * cout), f32)
    for kw in range(2):
      p = jnp.zeros((wh, wup), f32).at[jnp.arange(wh), 2 * jnp.arange(wh) + kw].set(1.0)
      a = a + jnp.kron(p, wt[:, :, kh, kw])
    a_par.append(a)
  a2 = jnp.concatenate(a_par, axis=1)                  # (Wh*Cin, 2*Wup*Cout) [even|odd]
  bt2 = jnp.tile(bt, 2 * wup)[None, :]                 # (1, 2*Wup*Cout)

  def conv_row_mats(w, win, wout):                     # w: (Cout, Cpart, 3, 3)
    mats = []
    for dh in range(3):
      b = jnp.zeros((win * w.shape[1], wout * w.shape[0]), f32)
      for dw in range(3):
        q = jnp.zeros((win, wout), f32).at[jnp.arange(wout) + dw, jnp.arange(wout)].set(1.0)
        b = b + jnp.kron(q, w[:, :, dh, dw].T)         # [(x*Cpart+c), (j*Cout+o)]
      mats.append(b)
    return mats

  def parity_pair(d0, d1, d2):
    # Block matrices acting on the parity-in-lanes layout; taps on super-row s (m0) and
    # s+1 (m1):  even_out = e@d0 + o@d1 + e'@d2 ;  odd_out = o@d0 + e'@d1 + o'@d2
    z = jnp.zeros_like(d0)
    m0 = jnp.block([[d0, z], [d1, d0]])
    m1 = jnp.block([[d2, d1], [z, d2]])
    return m0, m1

  bs0, bs1, bs2 = conv_row_mats(w1p[:, :cskip], wup, wo1)  # skip channels first in torch.cat
  bu0, bu1, bu2 = conv_row_mats(w1p[:, cskip:], wup, wo1)  # then the upsampled channels
  m0s, m1s = parity_pair(bs0, bs1, bs2)                # (2*Wup*Cskip, 2*Wo1*Cout)
  m0u, m1u = parity_pair(bu0, bu1, bu2)                # (2*Wup*Cout,  2*Wo1*Cout)

  # Fold ConvTranspose2d (weights + bias) straight into conv1's up-channel path: the
  # kernel never materializes the upsampled feature map and reads x1 un-repeated.
  wu0 = a2 @ m0u                                       # (Wh*Cin, 2*Wo1*Cout)
  wu1 = a2 @ m1u
  bias1 = jnp.tile(b1, 2 * wo1) + (bt2 @ (m0u + m1u))[0]
  bn1 = jnp.stack([bias1, jnp.tile(g1, 2 * wo1), jnp.tile(be1, 2 * wo1)], axis=0)

  c0, c1, c2 = conv_row_mats(w2p, wo1, wo2)
  n0, n1 = parity_pair(c0, c1, c2)                     # (2*Wo1*Cout, 2*Wo2*Cout)
  bn2 = jnp.stack([jnp.tile(b2, 2 * wo2), jnp.tile(g2, 2 * wo2), jnp.tile(be2, 2 * wo2)],
                  axis=0)

  # Per-channel reduce / broadcast matrices for in-kernel BatchNorm (hoisted out of the
  # kernel, passed as small VMEM inputs).
  def chan_sel(p, c):
    return (jnp.arange(p)[:, None] % c == jnp.arange(c)[None, :]).astype(f32)
  sel1 = chan_sel(2 * wo1 * cout, cout)
  sel2 = chan_sel(2 * wo2 * cout, cout)

  return (wu0.astype(bf16), wu1.astype(bf16), m0s.astype(bf16), m1s.astype(bf16),
          bn1, n0.astype(bf16), n1.astype(bf16), bn2,
          sel1, sel1.T, sel2, sel2.T)


def _vmem_limit_bytes():
  # v5e/v6e: 128 MiB physical VMEM; v7x: 64 MiB.  Use ~3/4 of physical (the fused kernel
  # itself needs <1 MiB at these shapes; this mostly matters for the row-tiled variant).
  try:
    cap = int(pltpu.get_tpu_info().vmem_capacity_bytes)
  except Exception:  # pragma: no cover - conservative fallback
    cap = 64 * 1024 * 1024
  return max(32 * 1024 * 1024, min(cap * 3 // 4, 100 * 1024 * 1024))


# --------------------------------------------------------------------------
# Public forward (takes / returns NCHW like the PyTorch module)
# --------------------------------------------------------------------------
def upsample_forward(params, x1_nchw, x2_nchw):
  n, cin, hh, wh = x1_nchw.shape
  _, cskip, h2, w2 = x2_nchw.shape
  cout = params["convt_w"].shape[1]
  assert cin == cskip + cout, (cin, cskip, cout)
  hup, wup = 2 * hh, 2 * wh
  ho1, wo1 = hup - 2, wup - 2
  ho2, wo2 = ho1 - 2, wo1 - 2

  packed = _pack_upsample(params, hh, wh, cskip)

  # Boundary-only layout conversion (tiny).  One kernel row per "super-row" (pair of
  # upsampled output rows); lanes hold [even output row | odd output row].
  x1l = jnp.transpose(x1_nchw, (0, 2, 3, 1)).reshape(n * hh, wh * cin).astype(jnp.bfloat16)

  # Crop of crop_and_concat (replicating the reference's `nj = j - mi` quirk); the concat
  # itself is fused into the kernel via the split conv1 weights.
  di, dj = w2 - wup, h2 - hup
  mi, mj = di // 2, dj // 2
  ni, nj = di - mi, dj - mi
  x2c = jnp.transpose(x2_nchw, (0, 2, 3, 1))[:, mj:h2 - nj, mi:w2 - ni, :]
  assert x2c.shape[1] == hup and x2c.shape[2] == wup, x2c.shape
  x2l = x2c.reshape(n * hh, 2 * wup * cskip).astype(jnp.bfloat16)

  kernel = functools.partial(
      _fused_upsample_kernel, hh=hh,
      count1=float(n * ho1 * wo1), count2=float(n * ho2 * wo2))

  vmem = lambda: pl.BlockSpec(memory_space=pltpu.MemorySpace.VMEM)
  out_l = pl.pallas_call(
      kernel,
      out_shape=jax.ShapeDtypeStruct((n * hh, 2 * wo2 * cout), jnp.float32),
      in_specs=[vmem() for _ in range(2 + len(packed))],
      out_specs=vmem(),
      compiler_params=pltpu.CompilerParams(vmem_limit_bytes=_vmem_limit_bytes()),
  )(x1l, x2l, *packed)

  # De-interleave the parity-in-lanes layout and drop the invalid boundary super-rows:
  # cheap XLA reshape/slice on the small, dense kernel output.
  out = out_l.reshape(n, hh, 2, wo2, cout)[:, :ho2 // 2]
  return out.reshape(n, ho2, wo2, cout).transpose(0, 3, 1, 2)   # back to NCHW


# --------------------------------------------------------------------------
# Pure-JAX reference (for a self-check) and parameter init
# --------------------------------------------------------------------------
def upsample_reference(params, x1, x2):
  wt, bt = params["convt_w"], params["convt_b"]
  n, cin, h1, w1 = x1.shape
  cout = wt.shape[1]
  up = jnp.einsum("ncij,coab->noiajb", x1, wt).reshape(n, cout, 2 * h1, 2 * w1)
  up = up + bt[None, :, None, None]

  di, dj = x2.shape[-1] - up.shape[-1], x2.shape[-2] - up.shape[-2]
  mi, mj = di // 2, dj // 2
  ni, nj = di - mi, dj - mi                      # reference quirk: j - mi
  x2c = x2[:, :, mj:x2.shape[-2] - nj, mi:x2.shape[-1] - ni]
  x = jnp.concatenate([x2c, up], axis=1)

  def conv_bn_relu(x, w, b, g, beta):
    y = lax.conv_general_dilated(x, w, (1, 1), "VALID",
                                 dimension_numbers=("NCHW", "OIHW", "NCHW"))
    y = y + b[None, :, None, None]
    mean = jnp.mean(y, axis=(0, 2, 3), keepdims=True)
    var = jnp.mean(jnp.square(y - mean), axis=(0, 2, 3), keepdims=True)
    y = (y - mean) * lax.rsqrt(var + EPS)
    y = y * g[None, :, None, None] + beta[None, :, None, None]
    return jnp.maximum(y, 0.0)

  x = conv_bn_relu(x, params["conv1_w"], params["conv1_b"], params["bn1_g"], params["bn1_b"])
  x = conv_bn_relu(x, params["conv2_w"], params["conv2_b"], params["bn2_g"], params["bn2_b"])
  return x


def init_upsample_params(key, in_channels, out_channels):
  ks = jax.random.split(key, 6)
  p = {}
  p["convt_w"] = 0.1 * jax.random.normal(ks[0], (in_channels, out_channels, 2, 2), jnp.float32)
  p["convt_b"] = 0.1 * jax.random.normal(ks[1], (out_channels,), jnp.float32)
  p["conv1_w"] = 0.1 * jax.random.normal(ks[2], (out_channels, in_channels, 3, 3), jnp.float32)
  p["conv1_b"] = 0.1 * jax.random.normal(ks[3], (out_channels,), jnp.float32)
  p["bn1_g"] = jnp.ones((out_channels,), jnp.float32)
  p["bn1_b"] = jnp.zeros((out_channels,), jnp.float32)
  p["conv2_w"] = 0.1 * jax.random.normal(ks[4], (out_channels, out_channels, 3, 3), jnp.float32)
  p["conv2_b"] = 0.1 * jax.random.normal(ks[5], (out_channels,), jnp.float32)
  p["bn2_g"] = jnp.ones((out_channels,), jnp.float32)
  p["bn2_b"] = jnp.zeros((out_channels,), jnp.float32)
  return p


# ----------------------------------- main ------------------------------------
if __name__ == "__main__":
  key = jax.random.PRNGKey(0)
  kp, k1, k2 = jax.random.split(key, 3)

  in_channels, out_channels = 8, 4
  params = init_upsample_params(kp, in_channels, out_channels)

  # x1: decoder feature (N, Cin, 8, 8); x2: skip feature (N, Cin-Cout, 18, 18)
  x1 = jax.random.normal(k1, (2, in_channels, 8, 8), jnp.float32)
  x2 = jax.random.normal(k2, (2, in_channels - out_channels, 18, 18), jnp.float32)

  out = jax.jit(upsample_forward)(params, x1, x2)
  out = jax.block_until_ready(out)

  # convT: 8x8 -> 16x16 ; concat -> 8 ch ; two valid 3x3 convs: 16 -> 14 -> 12
  assert out.shape == (2, out_channels, 12, 12), out.shape
  assert bool(jnp.all(jnp.isfinite(out)))

  ref = upsample_reference(params, x1, x2)
  assert bool(jnp.allclose(out, ref, atol=5e-2, rtol=5e-2)), \
      float(jnp.max(jnp.abs(out - ref)))

  print("KERNEL_OK")
</pallas_src>

<mosaic_0001>
module attributes {stable_mosaic.version = 11 : i64} {
  func.func @_fused_upsample_kernel(%arg0: memref<16x64xbf16, #tpu.memory_space<vmem>>, %arg1: memref<16x128xbf16, #tpu.memory_space<vmem>>, %arg2: memref<64x112xbf16, #tpu.memory_space<vmem>>, %arg3: memref<64x112xbf16, #tpu.memory_space<vmem>>, %arg4: memref<128x112xbf16, #tpu.memory_space<vmem>>, %arg5: memref<128x112xbf16, #tpu.memory_space<vmem>>, %arg6: memref<3x112xf32, #tpu.memory_space<vmem>>, %arg7: memref<112x96xbf16, #tpu.memory_space<vmem>>, %arg8: memref<112x96xbf16, #tpu.memory_space<vmem>>, %arg9: memref<3x96xf32, #tpu.memory_space<vmem>>, %arg10: memref<112x4xf32, #tpu.memory_space<vmem>>, %arg11: memref<4x112xf32, #tpu.memory_space<vmem>>, %arg12: memref<96x4xf32, #tpu.memory_space<vmem>>, %arg13: memref<4x96xf32, #tpu.memory_space<vmem>>, %arg14: memref<16x96xf32, #tpu.memory_space<vmem>>) attributes {dimension_semantics = [], scalar_prefetch = 0 : i64, scratch_operands = 0 : i64, tpu.core_type = #tpu.core_type<tc>} {
    %0 = tpu.iota {dimensions = array<i32: 0>} : vector<16x1xi32>
    %c8_i32 = arith.constant 8 : i32
    %c0_i32 = arith.constant 0 : i32
    %1 = arith.cmpi eq, %c8_i32, %c0_i32 : i32
    %c1_i32 = arith.constant 1 : i32
    %2 = arith.select %1, %c1_i32, %c8_i32 : i32
    %3 = vector.broadcast %2 : i32 to vector<16x1xi32>
    %4 = arith.remsi %0, %3 : vector<16x1xi32>
    %c0_i32_0 = arith.constant 0 : i32
    %5 = vector.broadcast %c0_i32_0 : i32 to vector<16x1xi32>
    %6 = arith.cmpi ne, %4, %5 : vector<16x1xi32>
    %c0_i32_1 = arith.constant 0 : i32
    %7 = vector.broadcast %c0_i32_1 : i32 to vector<16x1xi32>
    %8 = arith.cmpi slt, %4, %7 : vector<16x1xi32>
    %c0_i32_2 = arith.constant 0 : i32
    %9 = arith.cmpi slt, %2, %c0_i32_2 : i32
    %10 = vector.broadcast %9 : i1 to vector<16x1xi1>
    %11 = vector.broadcast %10 : vector<16x1xi1> to vector<16x1xi1>
    %12 = arith.xori %8, %11 : vector<16x1xi1>
    %13 = arith.andi %12, %6 : vector<16x1xi1>
    %14 = vector.broadcast %2 : i32 to vector<16x1xi32>
    %15 = arith.addi %4, %14 : vector<16x1xi32>
    %16 = arith.select %13, %15, %4 : vector<16x1xi1>, vector<16x1xi32>
    %c0 = arith.constant 0 : index
    %c0_3 = arith.constant 0 : index
    %17 = vector.load %arg0[%c0, %c0_3] : memref<16x64xbf16, #tpu.memory_space<vmem>>, vector<16x64xbf16>
    %c0_4 = arith.constant 0 : index
    %c0_5 = arith.constant 0 : index
    %18 = vector.load %arg1[%c0_4, %c0_5] : memref<16x128xbf16, #tpu.memory_space<vmem>>, vector<16x128xbf16>
    %c0_6 = arith.constant 0 : index
    %c0_7 = arith.constant 0 : index
    %19 = vector.load %arg2[%c0_6, %c0_7] : memref<64x112xbf16, #tpu.memory_space<vmem>>, vector<64x112xbf16>
    %cst = arith.constant dense<0.000000e+00> : vector<16x112xf32>
    %20 = tpu.matmul %17, %19, %cst {dimension_numbers = #tpu.dot_dimension_numbers<[1], [0], [0], [1], [0, 0, 1, 1], [], []>} : vector<16x64xbf16>, vector<64x112xbf16>, vector<16x112xf32> -> vector<16x112xf32>
    %c0_8 = arith.constant 0 : index
    %c0_9 = arith.constant 0 : index
    %21 = vector.load %arg4[%c0_8, %c0_9] : memref<128x112xbf16, #tpu.memory_space<vmem>>, vector<128x112xbf16>
    %cst_10 = arith.constant dense<0.000000e+00> : vector<16x112xf32>
    %22 = tpu.matmul %18, %21, %cst_10 {dimension_numbers = #tpu.dot_dimension_numbers<[1], [0], [0], [1], [0, 0, 1, 1], [], []>} : vector<16x128xbf16>, vector<128x112xbf16>, vector<16x112xf32> -> vector<16x112xf32>
    %23 = arith.addf %20, %22 : vector<16x112xf32>
    %c0_11 = arith.constant 0 : index
    %c0_12 = arith.constant 0 : index
    %24 = vector.load %arg3[%c0_11, %c0_12] : memref<64x112xbf16, #tpu.memory_space<vmem>>, vector<64x112xbf16>
    %cst_13 = arith.constant dense<0.000000e+00> : vector<16x112xf32>
    %25 = tpu.matmul %17, %24, %cst_13 {dimension_numbers = #tpu.dot_dimension_numbers<[1], [0], [0], [1], [0, 0, 1, 1], [], []>} : vector<16x64xbf16>, vector<64x112xbf16>, vector<16x112xf32> -> vector<16x112xf32>
    %c0_14 = arith.constant 0 : index
    %c0_15 = arith.constant 0 : index
    %26 = vector.load %arg5[%c0_14, %c0_15] : memref<128x112xbf16, #tpu.memory_space<vmem>>, vector<128x112xbf16>
    %cst_16 = arith.constant dense<0.000000e+00> : vector<16x112xf32>
    %27 = tpu.matmul %18, %26, %cst_16 {dimension_numbers = #tpu.dot_dimension_numbers<[1], [0], [0], [1], [0, 0, 1, 1], [], []>} : vector<16x128xbf16>, vector<128x112xbf16>, vector<16x112xf32> -> vector<16x112xf32>
    %28 = arith.addf %25, %27 : vector<16x112xf32>
    %29 = vector.extract_strided_slice %28 {offsets = [1, 0], sizes = [15, 112], strides = [1, 1]} : vector<16x112xf32> to vector<15x112xf32>
    %cst_17 = arith.constant 0.000000e+00 : f32
    %30 = vector.broadcast %cst_17 : f32 to vector<1x112xf32>
    %31 = tpu.concatenate %29, %30 in 0 : vector<15x112xf32>, vector<1x112xf32> -> vector<16x112xf32>
    %32 = arith.addf %23, %31 : vector<16x112xf32>
    %c0_18 = arith.constant 0 : index
    %c0_19 = arith.constant 0 : index
    %33 = vector.load %arg6[%c0_18, %c0_19] : memref<3x112xf32, #tpu.memory_space<vmem>>, vector<1x112xf32>
    %34 = vector.broadcast %33 : vector<1x112xf32> to vector<16x112xf32>
    %35 = arith.addf %32, %34 : vector<16x112xf32>
    %c7_i32 = arith.constant 7 : i32
    %36 = vector.broadcast %c7_i32 : i32 to vector<16x1xi32>
    %37 = arith.cmpi slt, %16, %36 : vector<16x1xi32>
    %38 = arith.extui %37 : vector<16x1xi1> to vector<16x1xi32>
    %39 = arith.sitofp %38 : vector<16x1xi32> to vector<16x1xf32>
    %40 = vector.broadcast %39 : vector<16x1xf32> to vector<16x112xf32>
    %41 = arith.mulf %35, %40 : vector<16x112xf32>
    %cst_20 = arith.constant dense<0.000000e+00> : vector<112xf32>
    %42 = vector.multi_reduction <add>, %41, %cst_20 [0] : vector<16x112xf32> to vector<112xf32>
    %43 = vector.shape_cast %42 : vector<112xf32> to vector<1x112xf32>
    %44 = arith.mulf %41, %35 : vector<16x112xf32>
    %cst_21 = arith.constant dense<0.000000e+00> : vector<112xf32>
    %45 = vector.multi_reduction <add>, %44, %cst_21 [0] : vector<16x112xf32> to vector<112xf32>
    %46 = vector.shape_cast %45 : vector<112xf32> to vector<1x112xf32>
    %c0_22 = arith.constant 0 : index
    %c0_23 = arith.constant 0 : index
    %47 = vector.load %arg10[%c0_22, %c0_23] : memref<112x4xf32, #tpu.memory_space<vmem>>, vector<112x4xf32>
    %cst_24 = arith.constant dense<0.000000e+00> : vector<1x4xf32>
    %48 = tpu.matmul %43, %47, %cst_24 {dimension_numbers = #tpu.dot_dimension_numbers<[1], [0], [0], [1], [0, 0, 1, 1], [], []>} : vector<1x112xf32>, vector<112x4xf32>, vector<1x4xf32> -> vector<1x4xf32>
    %cst_25 = arith.constant 0.00255102036 : f32
    %49 = vector.broadcast %cst_25 : f32 to vector<1x4xf32>
    %50 = arith.mulf %48, %49 : vector<1x4xf32>
    %c0_26 = arith.constant 0 : index
    %c0_27 = arith.constant 0 : index
    %51 = vector.load %arg10[%c0_26, %c0_27] : memref<112x4xf32, #tpu.memory_space<vmem>>, vector<112x4xf32>
    %cst_28 = arith.constant dense<0.000000e+00> : vector<1x4xf32>
    %52 = tpu.matmul %46, %51, %cst_28 {dimension_numbers = #tpu.dot_dimension_numbers<[1], [0], [0], [1], [0, 0, 1, 1], [], []>} : vector<1x112xf32>, vector<112x4xf32>, vector<1x4xf32> -> vector<1x4xf32>
    %cst_29 = arith.constant 0.00255102036 : f32
    %53 = vector.broadcast %cst_29 : f32 to vector<1x4xf32>
    %54 = arith.mulf %52, %53 : vector<1x4xf32>
    %55 = arith.mulf %50, %50 : vector<1x4xf32>
    %56 = arith.subf %54, %55 : vector<1x4xf32>
    %cst_30 = arith.constant 9.99999974E-6 : f32
    %57 = vector.broadcast %cst_30 : f32 to vector<1x4xf32>
    %58 = arith.addf %56, %57 : vector<1x4xf32>
    %59 = math.rsqrt %58 : vector<1x4xf32>
    %c0_31 = arith.constant 0 : index
    %c0_32 = arith.constant 0 : index
    %60 = vector.load %arg11[%c0_31, %c0_32] : memref<4x112xf32, #tpu.memory_space<vmem>>, vector<4x112xf32>
    %cst_33 = arith.constant dense<0.000000e+00> : vector<1x112xf32>
    %61 = tpu.matmul %50, %60, %cst_33 {dimension_numbers = #tpu.dot_dimension_numbers<[1], [0], [0], [1], [0, 0, 1, 1], [], []>} : vector<1x4xf32>, vector<4x112xf32>, vector<1x112xf32> -> vector<1x112xf32>
    %c0_34 = arith.constant 0 : index
    %c0_35 = arith.constant 0 : index
    %62 = vector.load %arg11[%c0_34, %c0_35] : memref<4x112xf32, #tpu.memory_space<vmem>>, vector<4x112xf32>
    %cst_36 = arith.constant dense<0.000000e+00> : vector<1x112xf32>
    %63 = tpu.matmul %59, %62, %cst_36 {dimension_numbers = #tpu.dot_dimension_numbers<[1], [0], [0], [1], [0, 0, 1, 1], [], []>} : vector<1x4xf32>, vector<4x112xf32>, vector<1x112xf32> -> vector<1x112xf32>
    %c1 = arith.constant 1 : index
    %c0_37 = arith.constant 0 : index
    %64 = vector.load %arg6[%c1, %c0_37] : memref<3x112xf32, #tpu.memory_space<vmem>>, vector<1x112xf32>
    %65 = arith.mulf %63, %64 : vector<1x112xf32>
    %66 = vector.broadcast %61 : vector<1x112xf32> to vector<16x112xf32>
    %67 = arith.subf %35, %66 : vector<16x112xf32>
    %68 = vector.broadcast %65 : vector<1x112xf32> to vector<16x112xf32>
    %69 = arith.mulf %67, %68 : vector<16x112xf32>
    %c2 = arith.constant 2 : index
    %c0_38 = arith.constant 0 : index
    %70 = vector.load %arg6[%c2, %c0_38] : memref<3x112xf32, #tpu.memory_space<vmem>>, vector<1x112xf32>
    %71 = vector.broadcast %70 : vector<1x112xf32> to vector<16x112xf32>
    %72 = arith.addf %69, %71 : vector<16x112xf32>
    %cst_39 = arith.constant 0.000000e+00 : f32
    %73 = vector.broadcast %cst_39 : f32 to vector<16x112xf32>
    %74 = arith.maximumf %72, %73 : vector<16x112xf32>
    %75 = arith.truncf %74 : vector<16x112xf32> to vector<16x112xbf16>
    %c0_40 = arith.constant 0 : index
    %c0_41 = arith.constant 0 : index
    %76 = vector.load %arg7[%c0_40, %c0_41] : memref<112x96xbf16, #tpu.memory_space<vmem>>, vector<112x96xbf16>
    %cst_42 = arith.constant dense<0.000000e+00> : vector<16x96xf32>
    %77 = tpu.matmul %75, %76, %cst_42 {dimension_numbers = #tpu.dot_dimension_numbers<[1], [0], [0], [1], [0, 0, 1, 1], [], []>} : vector<16x112xbf16>, vector<112x96xbf16>, vector<16x96xf32> -> vector<16x96xf32>
    %c0_43 = arith.constant 0 : index
    %c0_44 = arith.constant 0 : index
    %78 = vector.load %arg8[%c0_43, %c0_44] : memref<112x96xbf16, #tpu.memory_space<vmem>>, vector<112x96xbf16>
    %cst_45 = arith.constant dense<0.000000e+00> : vector<16x96xf32>
    %79 = tpu.matmul %75, %78, %cst_45 {dimension_numbers = #tpu.dot_dimension_numbers<[1], [0], [0], [1], [0, 0, 1, 1], [], []>} : vector<16x112xbf16>, vector<112x96xbf16>, vector<16x96xf32> -> vector<16x96xf32>
    %80 = vector.extract_strided_slice %79 {offsets = [1, 0], sizes = [15, 96], strides = [1, 1]} : vector<16x96xf32> to vector<15x96xf32>
    %cst_46 = arith.constant 0.000000e+00 : f32
    %81 = vector.broadcast %cst_46 : f32 to vector<1x96xf32>
    %82 = tpu.concatenate %80, %81 in 0 : vector<15x96xf32>, vector<1x96xf32> -> vector<16x96xf32>
    %83 = arith.addf %77, %82 : vector<16x96xf32>
    %c0_47 = arith.constant 0 : index
    %c0_48 = arith.constant 0 : index
    %84 = vector.load %arg9[%c0_47, %c0_48] : memref<3x96xf32, #tpu.memory_space<vmem>>, vector<1x96xf32>
    %85 = vector.broadcast %84 : vector<1x96xf32> to vector<16x96xf32>
    %86 = arith.addf %83, %85 : vector<16x96xf32>
    %c6_i32 = arith.constant 6 : i32
    %87 = vector.broadcast %c6_i32 : i32 to vector<16x1xi32>
    %88 = arith.cmpi slt, %16, %87 : vector<16x1xi32>
    %89 = arith.extui %88 : vector<16x1xi1> to vector<16x1xi32>
    %90 = arith.sitofp %89 : vector<16x1xi32> to vector<16x1xf32>
    %91 = vector.broadcast %90 : vector<16x1xf32> to vector<16x96xf32>
    %92 = arith.mulf %86, %91 : vector<16x96xf32>
    %cst_49 = arith.constant dense<0.000000e+00> : vector<96xf32>
    %93 = vector.multi_reduction <add>, %92, %cst_49 [0] : vector<16x96xf32> to vector<96xf32>
    %94 = vector.shape_cast %93 : vector<96xf32> to vector<1x96xf32>
    %95 = arith.mulf %92, %86 : vector<16x96xf32>
    %cst_50 = arith.constant dense<0.000000e+00> : vector<96xf32>
    %96 = vector.multi_reduction <add>, %95, %cst_50 [0] : vector<16x96xf32> to vector<96xf32>
    %97 = vector.shape_cast %96 : vector<96xf32> to vector<1x96xf32>
    %c0_51 = arith.constant 0 : index
    %c0_52 = arith.constant 0 : index
    %98 = vector.load %arg12[%c0_51, %c0_52] : memref<96x4xf32, #tpu.memory_space<vmem>>, vector<96x4xf32>
    %cst_53 = arith.constant dense<0.000000e+00> : vector<1x4xf32>
    %99 = tpu.matmul %94, %98, %cst_53 {dimension_numbers = #tpu.dot_dimension_numbers<[1], [0], [0], [1], [0, 0, 1, 1], [], []>} : vector<1x96xf32>, vector<96x4xf32>, vector<1x4xf32> -> vector<1x4xf32>
    %cst_54 = arith.constant 0.00347222225 : f32
    %100 = vector.broadcast %cst_54 : f32 to vector<1x4xf32>
    %101 = arith.mulf %99, %100 : vector<1x4xf32>
    %c0_55 = arith.constant 0 : index
    %c0_56 = arith.constant 0 : index
    %102 = vector.load %arg12[%c0_55, %c0_56] : memref<96x4xf32, #tpu.memory_space<vmem>>, vector<96x4xf32>
    %cst_57 = arith.constant dense<0.000000e+00> : vector<1x4xf32>
    %103 = tpu.matmul %97, %102, %cst_57 {dimension_numbers = #tpu.dot_dimension_numbers<[1], [0], [0], [1], [0, 0, 1, 1], [], []>} : vector<1x96xf32>, vector<96x4xf32>, vector<1x4xf32> -> vector<1x4xf32>
    %cst_58 = arith.constant 0.00347222225 : f32
    %104 = vector.broadcast %cst_58 : f32 to vector<1x4xf32>
    %105 = arith.mulf %103, %104 : vector<1x4xf32>
    %106 = arith.mulf %101, %101 : vector<1x4xf32>
    %107 = arith.subf %105, %106 : vector<1x4xf32>
    %cst_59 = arith.constant 9.99999974E-6 : f32
    %108 = vector.broadcast %cst_59 : f32 to vector<1x4xf32>
    %109 = arith.addf %107, %108 : vector<1x4xf32>
    %110 = math.rsqrt %109 : vector<1x4xf32>
    %c0_60 = arith.constant 0 : index
    %c0_61 = arith.constant 0 : index
    %111 = vector.load %arg13[%c0_60, %c0_61] : memref<4x96xf32, #tpu.memory_space<vmem>>, vector<4x96xf32>
    %cst_62 = arith.constant dense<0.000000e+00> : vector<1x96xf32>
    %112 = tpu.matmul %101, %111, %cst_62 {dimension_numbers = #tpu.dot_dimension_numbers<[1], [0], [0], [1], [0, 0, 1, 1], [], []>} : vector<1x4xf32>, vector<4x96xf32>, vector<1x96xf32> -> vector<1x96xf32>
    %c0_63 = arith.constant 0 : index
    %c0_64 = arith.constant 0 : index
    %113 = vector.load %arg13[%c0_63, %c0_64] : memref<4x96xf32, #tpu.memory_space<vmem>>, vector<4x96xf32>
    %cst_65 = arith.constant dense<0.000000e+00> : vector<1x96xf32>
    %114 = tpu.matmul %110, %113, %cst_65 {dimension_numbers = #tpu.dot_dimension_numbers<[1], [0], [0], [1], [0, 0, 1, 1], [], []>} : vector<1x4xf32>, vector<4x96xf32>, vector<1x96xf32> -> vector<1x96xf32>
    %c1_66 = arith.constant 1 : index
    %c0_67 = arith.constant 0 : index
    %115 = vector.load %arg9[%c1_66, %c0_67] : memref<3x96xf32, #tpu.memory_space<vmem>>, vector<1x96xf32>
    %116 = arith.mulf %114, %115 : vector<1x96xf32>
    %117 = vector.broadcast %112 : vector<1x96xf32> to vector<16x96xf32>
    %118 = arith.subf %86, %117 : vector<16x96xf32>
    %119 = vector.broadcast %116 : vector<1x96xf32> to vector<16x96xf32>
    %120 = arith.mulf %118, %119 : vector<16x96xf32>
    %c2_68 = arith.constant 2 : index
    %c0_69 = arith.constant 0 : index
    %121 = vector.load %arg9[%c2_68, %c0_69] : memref<3x96xf32, #tpu.memory_space<vmem>>, vector<1x96xf32>
    %122 = vector.broadcast %121 : vector<1x96xf32> to vector<16x96xf32>
    %123 = arith.addf %120, %122 : vector<16x96xf32>
    %cst_70 = arith.constant 0.000000e+00 : f32
    %124 = vector.broadcast %cst_70 : f32 to vector<16x96xf32>
    %125 = arith.maximumf %123, %124 : vector<16x96xf32>
    %c0_71 = arith.constant 0 : index
    %c0_72 = arith.constant 0 : index
    %126 = vector.load %arg14[%c0_71, %c0_72] : memref<16x96xf32, #tpu.memory_space<vmem>>, vector<16x96xf32>
    tpu.vector_store %arg14[%c0_71, %c0_72], %125 {strides = array<i32>} : memref<16x96xf32, #tpu.memory_space<vmem>>, vector<16x96xf32>,
    return
  }
}

</mosaic_0001>

<bundles_post_ra>
// kernel: tile.38
= control target key start
LH: loop header
LB: loop body
LE: loop exit
PB: predicated region body
PF: predicated region fallthrough
CT: control target
= control target key end

     0   :  { %s40_s0 = inlined_call_operand.vmem [shape: f32[4], index: 0, kind: input, shape index: {}]   ;;  %s41_s1 = inlined_call_operand.vmem [shape: f32[32,4], index: 1, kind: output, shape index: {}]  }
   0x1   :  { %v4_v0 = vld [vmem:[%s40_s0] ss:$0 sm:$0xff] }
   0x2   :  { %5 = vst [vmem:[%s41_s1] sm:$0xff] %v4_v0 }
   0x3   :  { %12 = vst [vmem:[%s41_s1 + $0x8] sm:$0xff] %v4_v0 }
   0x4   :  { %13 = vst [vmem:[%s41_s1 + $0x10] sm:$0xff] %v4_v0 }
   0x5   :  { %14 = vst [vmem:[%s41_s1 + $0x18] sm:$0xff] %v4_v0 }

// kernel: tile.43
= control target key start
LH: loop header
LB: loop body
LE: loop exit
PB: predicated region body
PF: predicated region fallthrough
CT: control target
= control target key end

     0   :  { %s40_s0 = inlined_call_operand.vmem [shape: f32[4], index: 0, kind: input, shape index: {}]   ;;  %s41_s1 = inlined_call_operand.vmem [shape: f32[28,4], index: 1, kind: output, shape index: {}]  }
   0x1   :  { %v4_v0 = vld [vmem:[%s40_s0] ss:$0 sm:$0xff] }
   0x2   :  { %5 = vst [vmem:[%s41_s1] sm:$0xff] %v4_v0 }
   0x3   :  { %12 = vst [vmem:[%s41_s1 + $0x8] sm:$0xff] %v4_v0 }
   0x4   :  { %13 = vst [vmem:[%s41_s1 + $0x10] sm:$0xff] %v4_v0 }
   0x5   :  { %14 = vst [vmem:[%s41_s1 + $0x18] sm:$0xff] %v4_v0 }

// kernel: tile.58
= control target key start
LH: loop header
LB: loop body
LE: loop exit
PB: predicated region body
PF: predicated region fallthrough
CT: control target
= control target key end

     0   :  { %s34_s0 = inlined_call_operand.vmem [shape: f32[4], index: 0, kind: input, shape index: {}]   ;;  %s35_s1 = inlined_call_operand.vmem [shape: f32[24,4], index: 1, kind: output, shape index: {}]  }
   0x1   :  { %v4_v0 = vld [vmem:[%s34_s0] ss:$0 sm:$0xff] }
   0x2   :  { %5 = vst [vmem:[%s35_s1] sm:$0xff] %v4_v0 }
   0x3   :  { %10 = vst [vmem:[%s35_s1 + $0x8] sm:$0xff] %v4_v0 }
   0x4   :  { %11 = vst [vmem:[%s35_s1 + $0x10] sm:$0xff] %v4_v0 }

// kernel: tile.67
= control target key start
LH: loop header
LB: loop body
LE: loop exit
PB: predicated region body
PF: predicated region fallthrough
CT: control target
= control target key end

     0   :  { %s195_s10 = smov 92   ;;  %s196_s11 = smov 84   ;;  %vm3_vm0 = vcmask 31744   ;;  %vm9_vm1 = vcmask 786144   ;;  %vm15_vm2 = vcmask 753344   ;;  %vm21_vm3 = vcmask 720544   ;;  %s303_s0 = inlined_call_operand.vmem [shape: f32[24,4], index: 0, kind: input, shape index: {}]   ;;  %s304_s1 = inlined_call_operand.vmem [shape: f32[1,96], index: 1, kind: output, shape index: {}]  }
   0x1   :  { %v149_v0 = vld [vmem:[%s303_s0 + $0x17] sm:$0x1]   ;;  %v151_v1 = vld [vmem:[%s303_s0 + $0x15] sm:$0x1]   ;;  %v153_v2 = vld [vmem:[%s303_s0 + $0x13] sm:$0x1]  }
   0x2   :  { %7 = vrot.lane.b32.xlu0 %v149_v0, %s195_s10  ;;  %19 = vrot.lane.b32.xlu1 %v151_v1, %s196_s11  ;;  %s197_s14 = smov 76   ;;  %v150_v3 = vld [vmem:[%s303_s0 + $0x16] sm:$0x1]   ;;  %v152_v4 = vld [vmem:[%s303_s0 + $0x14] sm:$0x1]   ;;  %s198_s19 = smov 88  }
   0x3   :  { %31 = vrot.lane.b32.xlu2 %v153_v2, %s197_s14  ;;  %s199_s20 = smov 80   ;;  %v154_v5 = vld [vmem:[%s303_s0 + $0x12] sm:$0x1]   ;;  %s200_s23 = smov 72   ;;  %v155_v6 = vld [vmem:[%s303_s0 + $0x11] sm:$0x1]  }
   0x4   :  { %v156_v7 = vld [vmem:[%s303_s0 + $0x10] sm:$0x1]   ;;  %s201_s28 = smov 68   ;;  %s202_s29 = smov 64   ;;  %v157_v8 = vld [vmem:[%s303_s0 + $0xf] sm:$0x1]  }
   0x5   :  { %s203_s3 = smov 60   ;;  %v158_v9 = vld [vmem:[%s303_s0 + $0xe] sm:$0x1]   ;;  %v159_v10 = vld [vmem:[%s303_s0 + $0xd] sm:$0x1]   ;;  %s204_s8 = smov 56  }
   0x6   :  { %s205_s9 = smov 52   ;;  %v160_v11 = vld [vmem:[%s303_s0 + $0xc] sm:$0x1]   ;;  %s206_s12 = smov 48   ;;  %v161_v12 = vld [vmem:[%s303_s0 + $0xb] sm:$0x1]  }
   0x7   :  { %v162_v13 = vld [vmem:[%s303_s0 + $0xa] sm:$0x1]   ;;  %s207_s17 = smov 44   ;;  %s208_s18 = smov 40   ;;  %v163_v14 = vld [vmem:[%s303_s0 + $0x9] sm:$0x1]  }
   0x8   :  { %s209_s21 = smov 36   ;;  %v164_v15 = vld [vmem:[%s303_s0 + $0x8] sm:$0x1]   ;;  %v165_v16 = vld [vmem:[%s303_s0 + $0x7] sm:$0x1]   ;;  %s210_s26 = smov 32  }
   0x9   :  { %s211_s27 = smov 28   ;;  %v166_v17 = vld [vmem:[%s303_s0 + $0x6] sm:$0x1]   ;;  %s212_s30 = smov 24   ;;  %v167_v18 = vld [vmem:[%s303_s0 + $0x5] sm:$0x1]  }
   0xa   :  { %13 = vrot.lane.b32.xlu0 %v150_v3, %s198_s19  ;;  %25 = vrot.lane.b32.xlu1 %v152_v4, %s199_s20  ;;  %v168_v19 = vld [vmem:[%s303_s0 + $0x4] sm:$0x1]   ;;  %s213_s6 = smov 20   ;;  %s214_s7 = smov 16   ;;  %v169_v20 = vld [vmem:[%s303_s0 + $0x3] sm:$0x1]  }
   0xb   :  { %37 = vrot.lane.b32.xlu2 %v154_v5, %s200_s23  ;;  %s215_s10 = smov 12   ;;  %v170_v21 = vld [vmem:[%s303_s0 + $0x2] sm:$0x1]   ;;  %v171_v22 = vld [vmem:[%s303_s0 + $0x1] sm:$0x1]   ;;  %s216_s15 = smov 8  }
   0xc   :  { %s217_s16 = smov 4   ;;  %v2_v23 = vld [vmem:[%s303_s0] sm:$0x1]   ;;  %vm27_vm4 = vcmask 687744   ;;  %vm33_vm5 = vcmask 654944   ;;  %vm39_vm6 = vcmask 622144  }
   0xd   :  { %4 = vst.msk [vmem:[#allocation0] sm:$0x1] %vm3_vm0, %v2_v23   ;;  %vm45_vm7 = vcmask 589344   ;;  %vm51_vm8 = vcmask 556544   ;;  %vm57_vm9 = vcmask 523744   ;;  %vm63_vm10 = vcmask 490944  }
   0xe   :  { %vm69_vm11 = vcmask 458144   ;;  %vm75_vm12 = vcmask 425344   ;;  %vm81_vm13 = vcmask 392544   ;;  %vm87_vm14 = vcmask 359744  }
   0xf   :  { %vm93_vm15 = vcmask 326944   ;;  %vm99_vm0 = vcmask 294144  }
  0x12   :  { %43 = vrot.lane.b32.xlu0 %v155_v6, %s201_s28  ;;  %49 = vrot.lane.b32.xlu1 %v156_v7, %s202_s29 }
  0x13   :  { %55 = vrot.lane.b32.xlu2 %v157_v8, %s203_s3 }
  0x1a   :  { %61 = vrot.lane.b32.xlu0 %v158_v9, %s204_s8  ;;  %67 = vrot.lane.b32.xlu1 %v159_v10, %s205_s9 }
  0x1b   :  { %73 = vrot.lane.b32.xlu2 %v160_v11, %s206_s12 }
  0x22   :  { %79 = vrot.lane.b32.xlu0 %v161_v12, %s207_s17  ;;  %85 = vrot.lane.b32.xlu1 %v162_v13, %s208_s18 }
  0x23   :  { %91 = vrot.lane.b32.xlu2 %v163_v14, %s209_s21 }
  0x2a   :  { %97 = vrot.lane.b32.xlu0 %v164_v15, %s210_s26  ;;  %103 = vrot.lane.b32.xlu1 %v165_v16, %s211_s27 }
  0x2b   :  { %109 = vrot.lane.b32.xlu2 %v166_v17, %s212_s30 }
  0x32   :  { %115 = vrot.lane.b32.xlu0 %v167_v18, %s213_s6  ;;  %121 = vrot.lane.b32.xlu1 %v168_v19, %s214_s7 }
  0x33   :  { %127 = vrot.lane.b32.xlu2 %v169_v20, %s215_s10 }
  0x3a   :  { %133 = vrot.lane.b32.xlu0 %v170_v21, %s216_s15  ;;  %139 = vrot.lane.b32.xlu1 %v171_v22, %s217_s16 }
  0x5d   :  { %v32_v24 = vpop.permute.xlu2 %31  }
  0x65   :  { %v38_v25 = vpop.permute.xlu2 %37  }
  0x6d   :  { %v56_v26 = vpop.permute.xlu2 %55  }
  0x74   :  { %v8_v27 = vpop.permute.xlu0 %7   ;;  %v20_v28 = vpop.permute.xlu1 %19  }
  0x75   :  { %10 = vst.msk [vmem:[#allocation0] sm:$0x1] %vm9_vm1, %v8_v27   ;;  %v74_v29 = vpop.permute.xlu2 %73   ;;  %vm105_vm1 = vcmask 261344  }
  0x7c   :  { %v14_v30 = vpop.permute.xlu0 %13   ;;  %v26_v31 = vpop.permute.xlu1 %25  }
  0x7d   :  { %16 = vst.msk [vmem:[#allocation0] sm:$0x1] %vm15_vm2, %v14_v30   ;;  %v92_v32 = vpop.permute.xlu2 %91   ;;  %vm111_vm2 = vcmask 228544  }
  0x7e   :  { %22 = vst.msk [vmem:[#allocation0] sm:$0x1] %vm21_vm3, %v20_v28   ;;  %vm117_vm3 = vcmask 195744  }
  0x7f   :  { %28 = vst.msk [vmem:[#allocation0] sm:$0x1] %vm27_vm4, %v26_v31   ;;  %vm123_vm4 = vcmask 162944  }
  0x80   :  { %34 = vst.msk [vmem:[#allocation0] sm:$0x1] %vm33_vm5, %v32_v24   ;;  %vm129_vm5 = vcmask 130144  }
  0x81   :  { %40 = vst.msk [vmem:[#allocation0] sm:$0x1] %vm39_vm6, %v38_v25   ;;  %vm135_vm6 = vcmask 97344  }
  0x84   :  { %v44_v33 = vpop.permute.xlu0 %43   ;;  %v50_v34 = vpop.permute.xlu1 %49  }
  0x85   :  { %46 = vst.msk [vmem:[#allocation0] sm:$0x1] %vm45_vm7, %v44_v33   ;;  %v110_v35 = vpop.permute.xlu2 %109   ;;  %vm141_vm7 = vcmask 64544  }
  0x86   :  { %52 = vst.msk [vmem:[#allocation0] sm:$0x1] %vm51_vm8, %v50_v34  }
  0x87   :  { %58 = vst.msk [vmem:[#allocation0] sm:$0x1] %vm57_vm9, %v56_v26  }
  0x8c   :  { %v62_v36 = vpop.permute.xlu0 %61   ;;  %v68_v37 = vpop.permute.xlu1 %67  }
  0x8d   :  { %64 = vst.msk [vmem:[#allocation0] sm:$0x1] %vm63_vm10, %v62_v36   ;;  %v128_v38 = vpop.permute.xlu2 %127  }
  0x8e   :  { %70 = vst.msk [vmem:[#allocation0] sm:$0x1] %vm69_vm11, %v68_v37  }
  0x8f   :  { %76 = vst.msk [vmem:[#allocation0] sm:$0x1] %vm75_vm12, %v74_v29  }
  0x94   :  { %v80_v39 = vpop.permute.xlu0 %79   ;;  %v86_v40 = vpop.permute.xlu1 %85  }
  0x95   :  { %82 = vst.msk [vmem:[#allocation0] sm:$0x1] %vm81_vm13, %v80_v39  }
  0x96   :  { %88 = vst.msk [vmem:[#allocation0] sm:$0x1] %vm87_vm14, %v86_v40  }
  0x97   :  { %94 = vst.msk [vmem:[#allocation0] sm:$0x1] %vm93_vm15, %v92_v32  }
  0x9c   :  { %v98_v41 = vpop.permute.xlu0 %97   ;;  %v104_v42 = vpop.permute.xlu1 %103  }
  0x9d   :  { %100 = vst.msk [vmem:[#allocation0] sm:$0x1] %vm99_vm0, %v98_v41  }
  0x9e   :  { %106 = vst.msk [vmem:[#allocation0] sm:$0x1] %vm105_vm1, %v104_v42  }
  0x9f   :  { %112 = vst.msk [vmem:[#allocation0] sm:$0x1] %vm111_vm2, %v110_v35  }
  0xa4   :  { %v116_v43 = vpop.permute.xlu0 %115   ;;  %v122_v44 = vpop.permute.xlu1 %121  }
  0xa5   :  { %118 = vst.msk [vmem:[#allocation0] sm:$0x1] %vm117_vm3, %v116_v43  }
  0xa6   :  { %124 = vst.msk [vmem:[#allocation0] sm:$0x1] %vm123_vm4, %v122_v44  }
  0xa7   :  { %130 = vst.msk [vmem:[#allocation0] sm:$0x1] %vm129_vm5, %v128_v38  }
  0xac   :  { %v134_v45 = vpop.permute.xlu0 %133   ;;  %v140_v46 = vpop.permute.xlu1 %139  }
  0xad   :  { %136 = vst.msk [vmem:[#allocation0] sm:$0x1] %vm135_vm6, %v134_v45  }
  0xae   :  { %142 = vst.msk [vmem:[#allocation0] sm:$0x1] %vm141_vm7, %v140_v46  }
  0xb5   :  { %v145_v47 = vld [vmem:[#allocation0] sm:$0x1] }
  0xb6   :  { %148 = vst [vmem:[%s304_s1] sm:$0x1] %v145_v47 }

// kernel: upsample_forward.1
= control target key start
LH: loop header
LB: loop body
LE: loop exit
PB: predicated region body
PF: predicated region fallthrough
CT: control target
= control target key end

     0   :  { %vm200_vm0 = vcmask 523264   ;;  %v48_v38 = vlaneseq  ;;  %vm344_vm1 = vcmask 1046528   ;;  %vm365_vm4 = vcmask 916480   ;;  %s1445_s5 = inlined_call_operand.vmem [shape: bf16[128,112], index: 5, kind: input, shape index: {}]   ;;  %s1446_s4 = inlined_call_operand.vmem [shape: bf16[128,112], index: 4, kind: input, shape index: {}]   ;;  %s1447_s3 = inlined_call_operand.vmem [shape: bf16[64,112], index: 3, kind: input, shape index: {}]   ;;  %s1448_s2 = inlined_call_operand.vmem [shape: bf16[64,112], index: 2, kind: input, shape index: {}]   ;;  %s1449_s0 = inlined_call_operand.vmem [shape: bf16[16,64], index: 0, kind: input, shape index: {}]   ;;  %s1450_s1 = inlined_call_operand.vmem [shape: bf16[16,128], index: 1, kind: input, shape index: {}]   ;;  %s1451_s6 = inlined_call_operand.vmem [shape: f32[3,112], index: 6, kind: input, shape index: {}]   ;;  %s1452_s10 = inlined_call_operand.vmem [shape: f32[112,4], index: 10, kind: input, shape index: {}]   ;;  %s1453_s11 = inlined_call_operand.vmem [shape: f32[4,112], index: 11, kind: input, shape index: {}]   ;;  %s1454_s8 = inlined_call_operand.vmem [shape: bf16[112,96], index: 8, kind: input, shape index: {}]   ;;  %s1455_s7 = inlined_call_operand.vmem [shape: bf16[112,96], index: 7, kind: input, shape index: {}]   ;;  %s1456_s9 = inlined_call_operand.vmem [shape: f32[3,96], index: 9, kind: input, shape index: {}]   ;;  %s1457_s12 = inlined_call_operand.vmem [shape: f32[96,4], index: 12, kind: input, shape index: {}]   ;;  %s1458_s13 = inlined_call_operand.vmem [shape: f32[4,96], index: 13, kind: input, shape index: {}]   ;;  %s1459_s14 = inlined_call_operand.vmem [shape: f32[16,96], index: 14, kind: output, shape index: {}]  }
   0x1   :  { %v1060_v0 = vld [vmem:[%s1445_s5 + $0x38] sm:$0xff]  ;;  %v1059_v3 = vld [vmem:[%s1445_s5 + $0x30] sm:$0xff]  ;;  %v1058_v7 = vld [vmem:[%s1445_s5 + $0x28] sm:$0xff]  ;;  %vm466_vm5 = vcmask 1043456   ;;  %vm462_vm6 = vcmask 31744   ;;  %vm691_vm12 = vcmask 785408  }
   0x2   :  { %v1048_v1 = vld [vmem:[%s1446_s4 + $0x38] sm:$0xff]  ;;  %290 = vmatpush.bf16.msra.mxu2 %v1060_v0  ;;  %v1047_v4 = vld [vmem:[%s1446_s4 + $0x30] sm:$0xff]  ;;  %v1046_v8 = vld [vmem:[%s1446_s4 + $0x28] sm:$0xff]  ;;  %v1280_v45 = vshrl.u32 %v48_v38, 7  ;;  %v1084_v0 = vmov 0.0  }
   0x3   :  { %v1052_v2 = vld [vmem:[%s1447_s3 + $0x18] sm:$0xff]  ;;  %157 = vmatpush.bf16.msra.mxu0 %v1048_v1  ;;  %v1051_v5 = vld [vmem:[%s1447_s3 + $0x10] sm:$0xff]  ;;  %v1050_v9 = vld [vmem:[%s1447_s3 + $0x8] sm:$0xff] }
   0x4   :  { %332 = vmatpush.bf16.msra.mxu3 %v1052_v2  ;;  %v1040_v6 = vld [vmem:[%s1448_s2 + $0x18] sm:$0xff]  ;;  %v1039_v10 = vld [vmem:[%s1448_s2 + $0x10] sm:$0xff]  ;;  %v1057_v11 = vld [vmem:[%s1445_s5 + $0x20] sm:$0xff]  ;;  %v1283_v46 = vadd.s32 8, %v1280_v45  ;;  %v55_v48 = vand.u32 7, %v1280_v45 }
   0x5   :  { %208 = vmatpush.bf16.msra.mxu1 %v1040_v6  ;;  %v1045_v12 = vld [vmem:[%s1446_s4 + $0x20] sm:$0xff]  ;;  %v1038_v14 = vld [vmem:[%s1448_s2 + $0x8] sm:$0xff]  ;;  %v1056_v15 = vld [vmem:[%s1445_s5 + $0x18] sm:$0xff] }
   0x6   :  { %291 = vmatpush.bf16.msra.mxu2 %v1059_v3  ;;  %v1049_v13 = vld [vmem:[%s1447_s3] sm:$0xff]  ;;  %v1044_v16 = vld [vmem:[%s1446_s4 + $0x18] sm:$0xff]  ;;  %v1055_v19 = vld [vmem:[%s1445_s5 + $0x10] sm:$0xff]  ;;  %v62_v50 = vand.u32 7, %v1283_v46  ;;  %vm357_vm2 = vcmp.lt.s32.totalorder %v55_v48, 7  ;;  %vm683_vm10 = vcmp.lt.s32.totalorder %v55_v48, 6 }
   0x7   :  { %158 = vmatpush.bf16.msra.mxu0 %v1047_v4  ;;  %v1035_v17 = vld [vmem:[%s1449_s0] sm:$0xff]  ;;  %v1043_v20 = vld [vmem:[%s1446_s4 + $0x10] sm:$0xff]  ;;  %v1054_v21 = vld [vmem:[%s1445_s5 + $0x8] sm:$0xff]  ;;  %v961_v1 = vsel %vm357_vm2, 1.0, %v1084_v0 }
   0x8   :  { %333 = vmatpush.bf16.msra.mxu3 %v1051_v5  ;;  %v1037_v18 = vld [vmem:[%s1448_s2] sm:$0xff]  ;;  %v1042_v22 = vld [vmem:[%s1446_s4 + $0x8] sm:$0xff]  ;;  %v397_v28 = vld [vmem:[%s1452_s10 + $0x58] sm:$0xff]  ;;  %vm358_vm3 = vcmp.lt.s32.totalorder %v62_v50, 7  ;;  %vm684_vm11 = vcmp.lt.s32.totalorder %v62_v50, 6 }
   0x9   :  { %209 = vmatpush.bf16.msra.mxu1 %v1039_v10  ;;  %v1053_v23 = vld [vmem:[%s1445_s5] sm:$0xff]  ;;  %v399_v26 = vld [vmem:[%s1452_s10 + $0x68] sm:$0xff]  ;;  %v396_v29 = vld [vmem:[%s1452_s10 + $0x50] sm:$0xff]  ;;  %v962_v2 = vsel %vm358_vm3, 1.0, %v1084_v0 }
   0xa   :  { %292 = vmatpush.bf16.msra.mxu2 %v1058_v7  ;;  %v1041_v24 = vld [vmem:[%s1446_s4] sm:$0xff]  ;;  %v395_v30 = vld [vmem:[%s1452_s10 + $0x48] sm:$0xff]  ;;  %v393_v32 = vld [vmem:[%s1452_s10 + $0x38] sm:$0xff] }
   0xb   :  { %159 = vmatpush.bf16.msra.mxu0 %v1046_v8  ;;  %v1036_v25 = vld [vmem:[%s1450_s1] sm:$0xff]  ;;  %v392_v33 = vld [vmem:[%s1452_s10 + $0x30] sm:$0xff]  ;;  %v391_v34 = vld [vmem:[%s1452_s10 + $0x28] sm:$0xff] }
   0xc   :  { %334 = vmatpush.bf16.msra.mxu3 %v1050_v9  ;;  %v398_v27 = vld [vmem:[%s1452_s10 + $0x60] sm:$0xff]  ;;  %v389_v36 = vld [vmem:[%s1452_s10 + $0x18] sm:$0xff]  ;;  %v388_v37 = vld [vmem:[%s1452_s10 + $0x10] sm:$0xff] }
   0xd   :  { %210 = vmatpush.bf16.msra.mxu1 %v1038_v14  ;;  %v394_v31 = vld [vmem:[%s1452_s10 + $0x40] sm:$0xff]  ;;  %v387_v39 = vld [vmem:[%s1452_s10 + $0x8] sm:$0xff] }
   0xe   :  { %293 = vmatpush.bf16.msra.mxu2 %v1057_v11  ;;  %v390_v35 = vld [vmem:[%s1452_s10 + $0x20] sm:$0xff] }
   0xf   :  { %160 = vmatpush.bf16.msra.mxu0 %v1045_v12  ;;  %v386_v43 = vld [vmem:[%s1452_s10] sm:$0xff] }
  0x10   :  { %335 = vmatpush.bf16.msra.mxu3 %v1049_v13  ;;  %v1076_v59 = vld [vmem:[%s1451_s6] ss:$0 sm:$0xff] }
  0x11   :  { %211 = vmatpush.bf16.msra.mxu1 %v1037_v18 }
  0x12   :  { %294 = vmatpush.bf16.msra.mxu2 %v1056_v15 }
  0x13   :  { %161 = vmatpush.bf16.msra.mxu0 %v1044_v16  ;;  %960 = vmatmul.msk.bf16.vlgmr.msra.gmra.mxu3 %vm200_vm0, %v1035_v17 }
  0x14   :  { %911 = vmatmul.msk.bf16.vlgmr.msra.gmra.mxu1 %vm200_vm0, %v1035_v17  ;;  %429 = vmatpush.msrb.mxu3 %v399_v26 }
  0x15   :  { %405 = vmatpush.msrb.mxu1 %v399_v26 }
  0x16   :  { %295 = vmatpush.bf16.msra.mxu2 %v1055_v19  ;;  %430 = vmatpush.msrb.mxu3 %v398_v27 }
  0x17   :  { %162 = vmatpush.bf16.msra.mxu0 %v1043_v20  ;;  %406 = vmatpush.msrb.mxu1 %v398_v27  ;;  %v461_v27 = vld [vmem:[%s1453_s11] sm:$0xf] }
  0x18   :  { %431 = vmatpush.msrb.mxu3 %v397_v28 }
  0x19   :  { %407 = vmatpush.msrb.mxu1 %v397_v28 }
  0x1a   :  { %296 = vmatpush.bf16.msra.mxu2 %v1054_v21  ;;  %432 = vmatpush.msrb.mxu3 %v396_v29 }
  0x1b   :  { %163 = vmatpush.bf16.msra.mxu0 %v1042_v22  ;;  %408 = vmatpush.msrb.mxu1 %v396_v29 }
  0x1c   :  { %433 = vmatpush.msrb.mxu3 %v395_v30 }
  0x1d   :  { %409 = vmatpush.msrb.mxu1 %v395_v30 }
  0x1e   :  { %297 = vmatpush.bf16.msra.mxu2 %v1053_v23  ;;  %434 = vmatpush.msrb.mxu3 %v394_v31 }
  0x1f   :  { %164 = vmatpush.bf16.msra.mxu0 %v1041_v24  ;;  %410 = vmatpush.msrb.mxu1 %v394_v31 }
  0x20   :  { %435 = vmatpush.msrb.mxu3 %v393_v32 }
  0x21   :  { %298 = vmatmul.bf16.vlgmr.msra.gmra.mxu2 %v1036_v25  ;;  %411 = vmatpush.msrb.mxu1 %v393_v32 }
  0x22   :  { %165 = vmatmul.bf16.vlgmr.msra.gmra.mxu0 %v1036_v25  ;;  %436 = vmatpush.msrb.mxu3 %v392_v33 }
  0x23   :  { %412 = vmatpush.msrb.mxu1 %v392_v33  ;;  %965 = vmatpush.msk.msrb.mxu0 %vm466_vm5, %v461_v27 }
  0x24   :  { %437 = vmatpush.msrb.mxu3 %v391_v34  ;;  %967 = vmatpush.msk.msrb.mxu2 %vm466_vm5, %v461_v27 }
  0x25   :  { %413 = vmatpush.msrb.mxu1 %v391_v34 }
  0x26   :  { %438 = vmatpush.msrb.mxu3 %v390_v35 }
  0x27   :  { %414 = vmatpush.msrb.mxu1 %v390_v35 }
  0x28   :  { %439 = vmatpush.msrb.mxu3 %v389_v36 }
  0x29   :  { %415 = vmatpush.msrb.mxu1 %v389_v36 }
  0x2a   :  { %440 = vmatpush.msrb.mxu3 %v388_v37 }
  0x2b   :  { %416 = vmatpush.msrb.mxu1 %v388_v37 }
  0x2c   :  { %441 = vmatpush.msrb.mxu3 %v387_v39 }
  0x2d   :  { %417 = vmatpush.msrb.mxu1 %v387_v39 }
  0x2e   :  { %442 = vmatpush.msrb.mxu3 %v386_v43 }
  0x2f   :  { %418 = vmatpush.msrb.mxu1 %v386_v43  ;;  %v1067_v43 = vld [vmem:[%s1455_s7 + $0x30] sm:$0xff] }
  0x30   :  { %666 = vmatpush.bf16.msra.mxu3 %v1067_v43 }
  0x91   :  { %v213_v42 = vpop.f32.mrf.mxu1 }
  0x96   :  { %v337_v40 = vpop.f32.mrf.mxu3 }
  0x99   :  { %v215_v53 = vpop.f32.mrf.mxu1 }
  0x9e   :  { %v339_v49 = vpop.f32.mrf.mxu3 }
  0x9f   :  { %v166_v41 = vpop.f32.mrf.mxu0 }
  0xa0   :  { %v214_v57 = vadd.f32 %v213_v42, %v166_v41  ;;  %v1074_v42 = vld [vmem:[%s1454_s8 + $0x30] sm:$0xff] }
  0xa1   :  { %602 = vmatpush.bf16.msra.mxu1 %v1074_v42 }
  0xa4   :  { %v299_v44 = vpop.f32.mrf.mxu2 }
  0xa5   :  { %v338_v47 = vadd.f32 %v337_v40, %v299_v44  ;;  %v1073_v44 = vld [vmem:[%s1454_s8 + $0x28] sm:$0xff] }
  0xa6   :  { %603 = vmatpush.bf16.msra.mxu1 %v1073_v44 }
  0xa7   :  { %v168_v52 = vpop.f32.mrf.mxu0  ;;  %v345_v55 = vrot.slane %v338_v47, 1  ;;  %v1066_v47 = vld [vmem:[%s1455_s7 + $0x28] sm:$0xff] }
  0xa8   :  { %v216_v58 = vadd.f32 %v215_v53, %v168_v52  ;;  %667 = vmatpush.bf16.msra.mxu3 %v1066_v47  ;;  %v1071_v52 = vld [vmem:[%s1454_s8 + $0x18] sm:$0xff] }
  0xa9   :  { %v1064_v53 = vld [vmem:[%s1455_s7 + $0x18] sm:$0xff] }
  0xac   :  { %v301_v51 = vpop.f32.mrf.mxu2 }
  0xad   :  { %v340_v54 = vadd.f32 %v339_v49, %v301_v51  ;;  %v1072_v49 = vld [vmem:[%s1454_s8 + $0x20] sm:$0xff] }
  0xae   :  { %v1065_v51 = vld [vmem:[%s1455_s7 + $0x20] sm:$0xff]  ;;  %604 = vmatpush.bf16.msra.mxu1 %v1072_v49 }
  0xaf   :  { %v346_v56 = vrot.slane %v340_v54, 1  ;;  %668 = vmatpush.bf16.msra.mxu3 %v1065_v51  ;;  %v1070_v54 = vld [vmem:[%s1454_s8 + $0x10] sm:$0xff] }
  0xb1   :  { %v347_v60 = vsel %vm344_vm1, %v345_v55, %v346_v56  ;;  %v350_v61 = vsel %vm344_vm1, %v346_v56, 0.0  ;;  %v1063_v55 = vld [vmem:[%s1455_s7 + $0x10] sm:$0xff]  ;;  %v1069_v56 = vld [vmem:[%s1454_s8 + $0x8] sm:$0xff] }
  0xb2   :  { %v351_v62 = vadd.f32 %v347_v60, %v214_v57  ;;  %v352_v63 = vadd.f32 %v350_v61, %v216_v58  ;;  %605 = vmatpush.bf16.msra.mxu1 %v1071_v52  ;;  %v1062_v57 = vld [vmem:[%s1455_s7 + $0x8] sm:$0xff]  ;;  %v1068_v58 = vld [vmem:[%s1454_s8] sm:$0xff] }
  0xb3   :  { %669 = vmatpush.bf16.msra.mxu3 %v1064_v53  ;;  %v513_v61 = vld [vmem:[%s1451_s6 + $0x1] sm:$0x1] }
  0xb4   :  { %v1298_v3 = vadd.f32 %v1076_v59, %v351_v62  ;;  %v1300_v4 = vadd.f32 %v1076_v59, %v352_v63  ;;  %v1061_v59 = vld [vmem:[%s1455_s7] sm:$0xff] }
  0xb6   :  { %v363_v5 = vmul.f32 %v961_v1, %v1298_v3  ;;  %v364_v6 = vmul.f32 %v962_v2, %v1300_v4  ;;  %606 = vmatpush.bf16.msra.mxu1 %v1070_v54 }
  0xb7   :  { %670 = vmatpush.bf16.msra.mxu3 %v1063_v55 }
  0xb8   :  { %v367_v7 = vsel %vm365_vm4, %v364_v6, 0.0  ;;  %v375_v8 = vmul.f32 %v363_v5, %v1298_v3  ;;  %v376_v9 = vmul.f32 %v364_v6, %v1300_v4  ;;  %v366_v10 = vsel %vm365_vm4, %v363_v5, 0.0 }
  0xb9   :  { %v368_v11 = vadd.f32 %v367_v7, %v366_v10  ;;  %v1077_v7 = vld [vmem:[%s1451_s6 + $0x2] ss:$0 sm:$0xff] }
  0xba   :  { %v378_v12 = vsel %vm365_vm4, %v376_v9, 0.0  ;;  %v377_v13 = vsel %vm365_vm4, %v375_v8, 0.0  ;;  %607 = vmatpush.bf16.msra.mxu1 %v1069_v56 }
  0xbb   :  { %v369_v14 = vrot.slane %v368_v11, 4  ;;  %v379_v15 = vadd.f32 %v378_v12, %v377_v13  ;;  %671 = vmatpush.bf16.msra.mxu3 %v1062_v57 }
  0xbd   :  { %v370_v16 = vadd.f32 %v369_v14, %v368_v11  ;;  %v380_v17 = vrot.slane %v379_v15, 4 }
  0xbe   :  { %608 = vmatpush.bf16.msra.mxu1 %v1068_v58 }
  0xbf   :  { %v371_v18 = vrot.slane %v370_v16, 2  ;;  %v381_v19 = vadd.f32 %v380_v17, %v379_v15  ;;  %672 = vmatpush.bf16.msra.mxu3 %v1061_v59  ;;  %v721_v15 = vld [vmem:[%s1457_s12 + $0x48] sm:$0xff]  ;;  %v719_v17 = vld [vmem:[%s1457_s12 + $0x38] sm:$0xff] }
  0xc1   :  { %v372_v20 = vadd.f32 %v371_v18, %v370_v16  ;;  %v382_v21 = vrot.slane %v381_v19, 2  ;;  %v720_v16 = vld [vmem:[%s1457_s12 + $0x40] sm:$0xff]  ;;  %v718_v18 = vld [vmem:[%s1457_s12 + $0x30] sm:$0xff] }
  0xc3   :  { %v373_v22 = vrot.slane %v372_v20, 1  ;;  %v383_v23 = vadd.f32 %v382_v21, %v381_v19  ;;  %v717_v19 = vld [vmem:[%s1457_s12 + $0x28] sm:$0xff]  ;;  %v715_v21 = vld [vmem:[%s1457_s12 + $0x18] sm:$0xff] }
  0xc5   :  { %v374_v24 = vadd.f32 %v373_v22, %v372_v20  ;;  %v384_v25 = vrot.slane %v383_v23, 1  ;;  %v716_v20 = vld [vmem:[%s1457_s12 + $0x20] sm:$0xff]  ;;  %v714_v22 = vld [vmem:[%s1457_s12 + $0x10] sm:$0xff] }
  0xc7   :  { %963 = vmatmul.msk.f32.vlgmr.msrb.gmra.mxu1 %vm365_vm4, %v374_v24  ;;  %v385_v26 = vadd.f32 %v384_v25, %v383_v23  ;;  %v713_v23 = vld [vmem:[%s1457_s12 + $0x8] sm:$0xff]  ;;  %v712_v25 = vld [vmem:[%s1457_s12] sm:$0xff] }
  0xc9   :  { %964 = vmatmul.msk.f32.vlgmr.msrb.gmra.mxu3 %vm365_vm4, %v385_v26 }
 0x144   :  { %v420_v28 = vpop.f32.mrf.mxu1 }
 0x145   :  { %v423_v29 = vmul.f32 0.0025510204, %v420_v28 }
 0x147   :  { %966 = vmatmul.msk.f32.vlgmr.msrb.gmra.mxu0 %vm462_vm6, %v423_v29  ;;  %v448_v31 = vmul.f32 %v423_v29, %v423_v29 }
 0x14c   :  { %v444_v30 = vpop.f32.mrf.mxu3 }
 0x14d   :  { %v447_v32 = vmul.f32 0.0025510204, %v444_v30  ;;  %v1078_v30 = vld [vmem:[%s1456_s9] ss:$0 sm:$0xff] }
 0x14f   :  { %v449_v33 = vsub.f32 %v447_v32, %v448_v31 }
 0x151   :  { %v450_v34 = vadd.f32 1e-05, %v449_v33  ;;  %v1027_v33 = vsel %vm683_vm10, 1.0, %v1084_v0 }
 0x153   :  { %1080 = vrsqrt.f32 %v450_v34  ;;  %vm457_vm8 = vweird.f32 %v450_v34 }
 0x159   :  { %v1081_v35 = vpop.eup %1080 }
 0x15a   :  { %v452_v36 = vmul.f32 %v1081_v35, %v450_v34  ;;  %vm458_vm7 = vweird.f32 %v1081_v35 }
 0x15b   :  { %vm459_vm9 = vmor %vm457_vm8, %vm458_vm7 }
 0x15c   :  { %v453_v37 = vmul.f32 %v1081_v35, %v452_v36 }
 0x15e   :  { %v454_v38 = vmul.f32 0.5, %v453_v37 }
 0x160   :  { %v455_v39 = vsub.f32 1.5, %v454_v38  ;;  %v1028_v38 = vsel %vm684_vm11, 1.0, %v1084_v0 }
 0x162   :  { %v456_v40 = vmul.f32 %v1081_v35, %v455_v39 }
 0x164   :  { %v460_v41 = vsel %vm459_vm9, %v1081_v35, %v456_v40 }
 0x165   :  { %968 = vmatmul.msk.f32.vlgmr.msrb.gmra.mxu2 %vm462_vm6, %v460_v41 }
 0x1c4   :  { %v487_v60 = vpop.f32.mrf.mxu0 }
 0x1c5   :  { %v515_v62 = vperm.slane %v487_v60, 0 }
 0x1c7   :  { %v516_v2 = vsub.f32 %v1298_v3, %v515_v62  ;;  %v517_v5 = vsub.f32 %v1300_v4, %v515_v62  ;;  %v723_v3 = vld [vmem:[%s1457_s12 + $0x58] sm:$0xff]  ;;  %v722_v4 = vld [vmem:[%s1457_s12 + $0x50] sm:$0xff] }
 0x1c8   :  { %731 = vmatpush.msra.mxu0 %v723_v3  ;;  %755 = vmatpush.msra.mxu2 %v723_v3 }
 0x1ca   :  { %732 = vmatpush.msra.mxu0 %v722_v4  ;;  %756 = vmatpush.msra.mxu2 %v722_v4  ;;  %v835_v4 = vld [vmem:[%s1456_s9 + $0x1] sm:$0x1] }
 0x1cc   :  { %733 = vmatpush.msra.mxu0 %v721_v15  ;;  %757 = vmatpush.msra.mxu2 %v721_v15 }
 0x1ce   :  { %734 = vmatpush.msra.mxu0 %v720_v16  ;;  %758 = vmatpush.msra.mxu2 %v720_v16 }
 0x1d0   :  { %735 = vmatpush.msra.mxu0 %v719_v17  ;;  %759 = vmatpush.msra.mxu2 %v719_v17 }
 0x1d2   :  { %736 = vmatpush.msra.mxu0 %v718_v18  ;;  %760 = vmatpush.msra.mxu2 %v718_v18 }
 0x1d4   :  { %737 = vmatpush.msra.mxu0 %v717_v19  ;;  %761 = vmatpush.msra.mxu2 %v717_v19 }
 0x1d6   :  { %738 = vmatpush.msra.mxu0 %v716_v20  ;;  %762 = vmatpush.msra.mxu2 %v716_v20 }
 0x1d8   :  { %739 = vmatpush.msra.mxu0 %v715_v21  ;;  %763 = vmatpush.msra.mxu2 %v715_v21  ;;  %v1079_v21 = vld [vmem:[%s1456_s9 + $0x2] ss:$0 sm:$0xff] }
 0x1da   :  { %740 = vmatpush.msra.mxu0 %v714_v22  ;;  %764 = vmatpush.msra.mxu2 %v714_v22 }
 0x1dc   :  { %741 = vmatpush.msra.mxu0 %v713_v23  ;;  %765 = vmatpush.msra.mxu2 %v713_v23 }
 0x1de   :  { %742 = vmatpush.msra.mxu0 %v712_v25  ;;  %766 = vmatpush.msra.mxu2 %v712_v25 }
 0x1e8   :  { %v510_v63 = vpop.f32.mrf.mxu2 }
 0x1e9   :  { %v514_v1 = vmul.f32 %v513_v61, %v510_v63  ;;  %v785_v61 = vld [vmem:[%s1458_s13] sm:$0xf] }
 0x1ea   :  { %1031 = vmatpush.msk.msrb.mxu0 %vm466_vm5, %v785_v61  ;;  %1033 = vmatpush.msk.msrb.mxu2 %vm466_vm5, %v785_v61 }
 0x1eb   :  { %v518_v6 = vperm.slane %v514_v1, 0 }
 0x1ed   :  { %v519_v8 = vmul.f32 %v518_v6, %v516_v2  ;;  %v520_v9 = vmul.f32 %v518_v6, %v517_v5 }
 0x1ef   :  { %v523_v10 = vadd.f32 %v1077_v7, %v519_v8  ;;  %v524_v11 = vadd.f32 %v1077_v7, %v520_v9 }
 0x1f1   :  { %v525_v12 = vmax.f32 %v523_v10, 0.0  ;;  %v526_v13 = vmax.f32 %v524_v11, 0.0 }
 0x1f3   :  { %v527_v14 = vpack.c.bf16 %v526_v13, %v525_v12 }
 0x1f5   :  { %997 = vmatmul.msk.bf16.vlgmr.msra.gmra.mxu1 %vm365_vm4, %v527_v14  ;;  %1026 = vmatmul.msk.bf16.vlgmr.msra.gmra.mxu3 %vm365_vm4, %v527_v14 }
 0x272   :  { %v610_v24 = vpop.f32.mrf.mxu1 }
 0x273   :  { %v617_v28 = vrot.slane %v610_v24, 1 }
 0x278   :  { %v674_v26 = vpop.f32.mrf.mxu3 }
 0x27a   :  { %v612_v27 = vpop.f32.mrf.mxu1 }
 0x27b   :  { %v618_v29 = vrot.slane %v612_v27, 1 }
 0x27d   :  { %v619_v31 = vsel %vm344_vm1, %v617_v28, %v618_v29  ;;  %v622_v34 = vsel %vm344_vm1, %v618_v29, 0.0 }
 0x27e   :  { %v675_v32 = vadd.f32 %v674_v26, %v619_v31 }
 0x280   :  { %v676_v35 = vpop.f32.mrf.mxu3  ;;  %v681_v36 = vadd.f32 %v1078_v30, %v675_v32 }
 0x281   :  { %v677_v37 = vadd.f32 %v676_v35, %v622_v34 }
 0x282   :  { %v689_v39 = vmul.f32 %v1027_v33, %v681_v36 }
 0x283   :  { %v682_v40 = vadd.f32 %v1078_v30, %v677_v37 }
 0x284   :  { %v701_v48 = vmul.f32 %v689_v39, %v681_v36  ;;  %v692_v41 = vsel %vm691_vm12, %v689_v39, 0.0 }
 0x285   :  { %v690_v45 = vmul.f32 %v1028_v38, %v682_v40 }
 0x286   :  { %v703_v43 = vsel %vm691_vm12, %v701_v48, 0.0 }
 0x287   :  { %v693_v42 = vsel %vm691_vm12, %v690_v45, 0.0  ;;  %v702_v46 = vmul.f32 %v690_v45, %v682_v40 }
 0x288   :  { %v694_v50 = vadd.f32 %v693_v42, %v692_v41 }
 0x289   :  { %v704_v44 = vsel %vm691_vm12, %v702_v46, 0.0 }
 0x28a   :  { %v695_v47 = vrot.slane %v694_v50, 4  ;;  %v705_v49 = vadd.f32 %v704_v44, %v703_v43 }
 0x28c   :  { %v696_v51 = vadd.f32 %v695_v47, %v694_v50  ;;  %v706_v52 = vrot.slane %v705_v49, 4 }
 0x28e   :  { %v697_v0 = vrot.slane %v696_v51, 2  ;;  %v707_v53 = vadd.f32 %v706_v52, %v705_v49 }
 0x290   :  { %v708_v54 = vrot.slane %v707_v53, 2  ;;  %v698_v55 = vadd.f32 %v697_v0, %v696_v51 }
 0x292   :  { %v699_v56 = vrot.slane %v698_v55, 1  ;;  %v709_v57 = vadd.f32 %v708_v54, %v707_v53 }
 0x294   :  { %v700_v58 = vadd.f32 %v699_v56, %v698_v55  ;;  %v710_v59 = vrot.slane %v709_v57, 1 }
 0x296   :  { %1029 = vmatmul.msk.f32.vlgmr.msra.gmra.mxu0 %vm691_vm12, %v700_v58  ;;  %v711_v60 = vadd.f32 %v710_v59, %v709_v57 }
 0x298   :  { %1030 = vmatmul.msk.f32.vlgmr.msra.gmra.mxu2 %vm691_vm12, %v711_v60 }
 0x313   :  { %v744_v62 = vpop.f32.mrf.mxu0 }
 0x314   :  { %v747_v63 = vmul.f32 0.0034722222, %v744_v62 }
 0x316   :  { %1032 = vmatmul.msk.f32.vlgmr.msrb.gmra.mxu0 %vm462_vm6, %v747_v63  ;;  %v772_v2 = vmul.f32 %v747_v63, %v747_v63 }
 0x31b   :  { %v768_v1 = vpop.f32.mrf.mxu2 }
 0x31c   :  { %v771_v5 = vmul.f32 0.0034722222, %v768_v1 }
 0x31e   :  { %v773_v6 = vsub.f32 %v771_v5, %v772_v2 }
 0x320   :  { %v774_v7 = vadd.f32 1e-05, %v773_v6 }
 0x322   :  { %1082 = vrsqrt.f32 %v774_v7  ;;  %vm781_vm14 = vweird.f32 %v774_v7 }
 0x328   :  { %v1083_v8 = vpop.eup %1082 }
 0x329   :  { %v776_v9 = vmul.f32 %v1083_v8, %v774_v7  ;;  %vm782_vm13 = vweird.f32 %v1083_v8 }
 0x32a   :  { %vm783_vm15 = vmor %vm781_vm14, %vm782_vm13 }
 0x32b   :  { %v777_v10 = vmul.f32 %v1083_v8, %v776_v9 }
 0x32d   :  { %v778_v11 = vmul.f32 0.5, %v777_v10 }
 0x32f   :  { %v779_v12 = vsub.f32 1.5, %v778_v11 }
 0x331   :  { %v780_v13 = vmul.f32 %v1083_v8, %v779_v12 }
 0x333   :  { %v784_v14 = vsel %vm783_vm15, %v1083_v8, %v780_v13 }
 0x334   :  { %1034 = vmatmul.msk.f32.vlgmr.msrb.gmra.mxu2 %vm462_vm6, %v784_v14 }
 0x393   :  { %v809_v3 = vpop.f32.mrf.mxu0 }
 0x394   :  { %v837_v15 = vperm.slane %v809_v3, 0 }
 0x396   :  { %v838_v18 = vsub.f32 %v681_v36, %v837_v15  ;;  %v839_v19 = vsub.f32 %v682_v40, %v837_v15 }
 0x3b7   :  { %v832_v16 = vpop.f32.mrf.mxu2 }
 0x3b8   :  { %v836_v17 = vmul.f32 %v835_v4, %v832_v16 }
 0x3ba   :  { %v840_v20 = vperm.slane %v836_v17, 0 }
 0x3bc   :  { %v841_v22 = vmul.f32 %v840_v20, %v838_v18  ;;  %v842_v23 = vmul.f32 %v840_v20, %v839_v19 }
 0x3be   :  { %v845_v24 = vadd.f32 %v1079_v21, %v841_v22  ;;  %v846_v25 = vadd.f32 %v1079_v21, %v842_v23 }
 0x3c0   :  { %v847_v26 = vmax.f32 %v845_v24, 0.0  ;;  %v848_v27 = vmax.f32 %v846_v25, 0.0 }
 0x3c2   :  { %849 = vst.msk [vmem:[%s1459_s14] sm:$0xff] %vm691_vm12, %v847_v26 }
 0x3c3   :  { %850 = vst.msk [vmem:[%s1459_s14 + $0x8] sm:$0xff] %vm691_vm12, %v848_v27 }

</bundles_post_ra>
